<compile_context>
chip_gen: v5e
topology: v5e:2x2
jax: 0.10.0
libtpu: 0.0.40
codegen_flags: <defaults>
</compile_context>

<pallas_src>
import functools

import jax
import jax.numpy as jnp
from jax.experimental import pallas as pl
from jax.experimental.pallas import tpu as pltpu


def _round_up(a, m):
    return ((a + m - 1) // m) * m


def _fm_kernel(xt_ref, w_ref, bias_ref, out_ref, *, V, E, F, bcast_load):
    # xt_ref:  (F, block_b) int32   -- feature indices, batch on the lane axis
    # w_ref:   (rows_pad, V) f32    -- rows 0..E-1: embed_w^T, row E: sum_e embed^2, row E+1: fc^T
    # bias_ref:(1,) f32 in SMEM
    # out_ref: (1, block_b) f32     -- lane-dense output row
    w = w_ref[...]                                               # (rows_pad, V) f32
    blk = out_ref.shape[-1]

    # Counts matrix C^T[v, b] = #{f : x[b, f] == v}  (the in-kernel "gather").
    v_iota = jax.lax.broadcasted_iota(jnp.int32, (V, blk), 0)    # (V, blk)
    c = jnp.zeros((V, blk), jnp.float32)
    for f in range(F):                                           # static unroll, F is small
        if bcast_load:
            # stride-0 sublane-broadcast load: row f arrives already broadcast to (V, blk),
            # straight from the load slots instead of a per-field broadcast_in_dim.
            xf = xt_ref[pl.ds(f, V, stride=0), :]
        else:
            xf = xt_ref[f:f + 1, :]                              # (1, blk); broadcast in compare
        c = c + (xf == v_iota).astype(jnp.float32)

    # One MXU matmul produces field_sum (rows 0..E-1), sum_of_square (row E), linear (row E+1).
    fused = jnp.dot(w, c, preferred_element_type=jnp.float32)    # (rows_pad, blk)

    field_sum = fused[:E, :]                                     # (E, blk)
    square_of_sum = jnp.sum(field_sum * field_sum, axis=0, keepdims=True)   # (1, blk)
    sum_of_square = fused[E:E + 1, :]                            # (1, blk)
    linear = fused[E + 1:E + 2, :]                               # (1, blk)

    fm_term = 0.5 * (square_of_sum - sum_of_square)              # FactorizationMachine(reduce_sum)
    logit = linear + bias_ref[0] + fm_term                       # FeaturesLinear + FM
    out_ref[...] = jax.nn.sigmoid(logit)


def _build_fm_call(*, V, E, F, rows_pad, block_b, num_tiles, b_pad, optimized):
    if optimized:
        # Grid-invariant table: whole array resident in VMEM, copied once, NOT double-buffered.
        table_spec = pl.BlockSpec(memory_space=pltpu.MemorySpace.VMEM)
    else:
        table_spec = pl.BlockSpec((rows_pad, V), lambda i: (0, 0))
    return pl.pallas_call(
        functools.partial(_fm_kernel, V=V, E=E, F=F, bcast_load=optimized),
        out_shape=jax.ShapeDtypeStruct((1, b_pad), jnp.float32),
        grid=(num_tiles,),
        in_specs=[
            pl.BlockSpec((F, block_b), lambda i: (0, i)),            # lane-dense index tile
            table_spec,                                              # augmented weight table
            pl.BlockSpec(memory_space=pltpu.MemorySpace.SMEM),       # bias scalar
        ],
        out_specs=pl.BlockSpec((1, block_b), lambda i: (0, i)),      # lane-dense output row
        compiler_params=pltpu.CompilerParams(
            dimension_semantics=("parallel",),
            vmem_limit_bytes=32 * 1024 * 1024),
    )


def fm_model_forward(x, embed_w, fc_w, bias, *, block_b=2048):
    """x: (B, F) int32; embed_w: (V, E) f32; fc_w: (V, 1) f32; bias: (1,) f32 -> (B,) f32."""
    B, F = x.shape
    V, E = embed_w.shape
    embed_w = embed_w.astype(jnp.float32)
    fc_w = fc_w.astype(jnp.float32)

    # Batch tiling: big lane-multiple tiles, but keep >= 2 tiles (when the batch allows it)
    # so both of v7x's TensorCores get work under dimension_semantics=("parallel",).
    b_pad = _round_up(B, 128)
    blk = _round_up(min(block_b, b_pad), 128)
    if b_pad > 128 and blk >= b_pad:
        blk = _round_up(pl.cdiv(b_pad, 2), 128)
    b_pad = _round_up(b_pad, blk)
    num_tiles = b_pad // blk

    # Indices transposed so batch sits on the lane axis; padded columns use index 0 (discarded).
    x_t = jnp.pad(x.astype(jnp.int32).T, ((0, 0), (0, b_pad - B)))        # (F, b_pad)

    # Augmented, transposed weight table (tiny; resident in VMEM, fetched once).
    rows = E + 2
    rows_pad = _round_up(rows, 8)
    w_aug_t = jnp.zeros((rows_pad, V), jnp.float32)
    w_aug_t = w_aug_t.at[:E, :].set(embed_w.T)
    w_aug_t = w_aug_t.at[E, :].set(jnp.sum(embed_w * embed_w, axis=1))
    w_aug_t = w_aug_t.at[E + 1, :].set(fc_w[:, 0])

    bias_smem = bias.reshape(1).astype(jnp.float32)

    kwargs = dict(V=V, E=E, F=F, rows_pad=rows_pad, block_b=blk,
                  num_tiles=num_tiles, b_pad=b_pad)
    try:
        out2d = _build_fm_call(optimized=True, **kwargs)(x_t, w_aug_t, bias_smem)
    except Exception:
        # Fallback (eager-call only): JAX builds without stride-0 broadcast loads or
        # memory-space-only VMEM input specs get the previously-validated structure
        # (broadcast-compare counts build + blocked grid-invariant table spec).
        out2d = _build_fm_call(optimized=False, **kwargs)(x_t, w_aug_t, bias_smem)

    return out2d[0, :B]                                              # squeeze(1) + drop padding


def _reference(x, embed_w, fc_w, bias):
    emb = jnp.take(embed_w, x, axis=0)                               # (B, F, E)
    lin = jnp.take(fc_w, x, axis=0)                                  # (B, F, 1)
    square_of_sum = jnp.sum(emb, axis=1) ** 2
    sum_of_square = jnp.sum(emb ** 2, axis=1)
    ix = jnp.sum(square_of_sum - sum_of_square, axis=1, keepdims=True)
    fm = 0.5 * ix
    linear = jnp.sum(lin, axis=1) + bias                             # (B, 1)
    return jax.nn.sigmoid((linear + fm)[:, 0])


if __name__ == "__main__":
    key = jax.random.PRNGKey(0)
    k1, k2, k3, k4 = jax.random.split(key, 4)

    # field_dims = [10, 12, 6, 4] -> vocab = 32 ; embed_dim = 32
    field_dims = [10, 12, 6, 4]
    vocab = sum(field_dims)
    embed_dim = 32
    F = len(field_dims)

    # FeaturesEmbedding: xavier_uniform_ on (vocab, embed_dim)
    limit = (6.0 / (vocab + embed_dim)) ** 0.5
    embed_w = jax.random.uniform(k1, (vocab, embed_dim),
                                 minval=-limit, maxval=limit, dtype=jnp.float32)
    # FeaturesLinear.fc: nn.Embedding default init N(0, 1) on (vocab, 1)
    fc_w = jax.random.normal(k2, (vocab, 1), dtype=jnp.float32)
    # bias: zeros((1,))
    bias = jnp.zeros((1,), dtype=jnp.float32)

    # Small-shape check (B=8, single tile) plus a multi-tile check (B=300 -> 2 batch tiles)
    # that exercises the enlarged-block / >=2-tile grid and the batch padding discard.
    for B, kk in ((8, k3), (300, k4)):
        x = jax.random.randint(kk, (B, F), minval=0, maxval=vocab, dtype=jnp.int32)
        out = jax.block_until_ready(fm_model_forward(x, embed_w, fc_w, bias))
        ref = _reference(x, embed_w, fc_w, bias)
        assert out.shape == (B,)
        assert jnp.allclose(out, ref, atol=2e-3, rtol=2e-3), (B, out, ref)

    print("KERNEL_OK")
</pallas_src>

<mosaic_0001>
module attributes {stable_mosaic.version = 11 : i64} {
  func.func @_fm_kernel(%arg0: i32, %arg1: memref<4x128xi32, #tpu.memory_space<vmem>>, %arg2: memref<40x32xf32, #tpu.memory_space<vmem>>, %arg3: memref<1xf32, #tpu.memory_space<smem>>, %arg4: memref<1x128xf32, #tpu.memory_space<vmem>>) attributes {dimension_semantics = [#tpu.dimension_semantics<parallel>], iteration_bounds = array<i64: 1>, scalar_prefetch = 0 : i64, scratch_operands = 0 : i64, tpu.core_type = #tpu.core_type<tc>, window_params = [{transform_indices = @transform_0, window_bounds = array<i64: 4, 128>}, {pipeline_mode = #tpu.pipeline_mode<synchronous>, transform_indices = @transform_1, window_bounds = array<i64: 40, 32>}, {transform_indices = @transform_2, window_bounds = array<i64: 1>}, {transform_indices = @transform_3, window_bounds = array<i64: 1, 128>}]} {
    %c0 = arith.constant 0 : index
    %c0_0 = arith.constant 0 : index
    %0 = vector.load %arg2[%c0, %c0_0] : memref<40x32xf32, #tpu.memory_space<vmem>>, vector<40x32xf32>
    %1 = tpu.iota {dimensions = array<i32: 0>} : vector<32x128xi32>
    %cst = arith.constant 0.000000e+00 : f32
    %2 = vector.broadcast %cst : f32 to vector<32x128xf32>
    %c0_1 = arith.constant 0 : index
    %c0_2 = arith.constant 0 : index
    %3 = tpu.strided_load %arg1[%c0_1, %c0_2] {strides = array<i32: 0, 1>} : memref<4x128xi32, #tpu.memory_space<vmem>>, vector<32x128xi32>
    %4 = arith.cmpi eq, %3, %1 : vector<32x128xi32>
    %5 = arith.extui %4 : vector<32x128xi1> to vector<32x128xi32>
    %6 = arith.sitofp %5 : vector<32x128xi32> to vector<32x128xf32>
    %7 = arith.addf %2, %6 : vector<32x128xf32>
    %c1 = arith.constant 1 : index
    %c0_3 = arith.constant 0 : index
    %8 = tpu.strided_load %arg1[%c1, %c0_3] {strides = array<i32: 0, 1>} : memref<4x128xi32, #tpu.memory_space<vmem>>, vector<32x128xi32>
    %9 = arith.cmpi eq, %8, %1 : vector<32x128xi32>
    %10 = arith.extui %9 : vector<32x128xi1> to vector<32x128xi32>
    %11 = arith.sitofp %10 : vector<32x128xi32> to vector<32x128xf32>
    %12 = arith.addf %7, %11 : vector<32x128xf32>
    %c2 = arith.constant 2 : index
    %c0_4 = arith.constant 0 : index
    %13 = tpu.strided_load %arg1[%c2, %c0_4] {strides = array<i32: 0, 1>} : memref<4x128xi32, #tpu.memory_space<vmem>>, vector<32x128xi32>
    %14 = arith.cmpi eq, %13, %1 : vector<32x128xi32>
    %15 = arith.extui %14 : vector<32x128xi1> to vector<32x128xi32>
    %16 = arith.sitofp %15 : vector<32x128xi32> to vector<32x128xf32>
    %17 = arith.addf %12, %16 : vector<32x128xf32>
    %c3 = arith.constant 3 : index
    %c0_5 = arith.constant 0 : index
    %18 = tpu.strided_load %arg1[%c3, %c0_5] {strides = array<i32: 0, 1>} : memref<4x128xi32, #tpu.memory_space<vmem>>, vector<32x128xi32>
    %19 = arith.cmpi eq, %18, %1 : vector<32x128xi32>
    %20 = arith.extui %19 : vector<32x128xi1> to vector<32x128xi32>
    %21 = arith.sitofp %20 : vector<32x128xi32> to vector<32x128xf32>
    %22 = arith.addf %17, %21 : vector<32x128xf32>
    %cst_6 = arith.constant dense<0.000000e+00> : vector<40x128xf32>
    %23 = tpu.matmul %0, %22, %cst_6 {dimension_numbers = #tpu.dot_dimension_numbers<[1], [0], [0], [1], [0, 0, 1, 1], [], []>} : vector<40x32xf32>, vector<32x128xf32>, vector<40x128xf32> -> vector<40x128xf32>
    %24 = vector.extract_strided_slice %23 {offsets = [0, 0], sizes = [32, 128], strides = [1, 1]} : vector<40x128xf32> to vector<32x128xf32>
    %25 = arith.mulf %24, %24 : vector<32x128xf32>
    %cst_7 = arith.constant dense<0.000000e+00> : vector<128xf32>
    %26 = vector.multi_reduction <add>, %25, %cst_7 [0] : vector<32x128xf32> to vector<128xf32>
    %27 = vector.shape_cast %26 : vector<128xf32> to vector<1x128xf32>
    %28 = vector.extract_strided_slice %23 {offsets = [32, 0], sizes = [1, 128], strides = [1, 1]} : vector<40x128xf32> to vector<1x128xf32>
    %29 = vector.extract_strided_slice %23 {offsets = [33, 0], sizes = [1, 128], strides = [1, 1]} : vector<40x128xf32> to vector<1x128xf32>
    %30 = arith.subf %27, %28 : vector<1x128xf32>
    %cst_8 = arith.constant 5.000000e-01 : f32
    %31 = vector.broadcast %cst_8 : f32 to vector<1x128xf32>
    %32 = arith.mulf %31, %30 : vector<1x128xf32>
    %c0_9 = arith.constant 0 : index
    %33 = memref.load %arg3[%c0_9] : memref<1xf32, #tpu.memory_space<smem>>
    %34 = vector.broadcast %33 : f32 to vector<1x128xf32>
    %35 = arith.addf %29, %34 : vector<1x128xf32>
    %36 = arith.addf %35, %32 : vector<1x128xf32>
    %37 = arith.negf %36 : vector<1x128xf32>
    %38 = math.exp %37 : vector<1x128xf32>
    %cst_10 = arith.constant 1.000000e+00 : f32
    %39 = vector.broadcast %cst_10 : f32 to vector<1x128xf32>
    %40 = arith.addf %39, %38 : vector<1x128xf32>
    %41 = arith.divf %39, %40 : vector<1x128xf32>
    %c0_11 = arith.constant 0 : index
    %c0_12 = arith.constant 0 : index
    %42 = vector.load %arg4[%c0_11, %c0_12] : memref<1x128xf32, #tpu.memory_space<vmem>>, vector<1x128xf32>
    tpu.vector_store %arg4[%c0_11, %c0_12], %41 {strides = array<i32>} : memref<1x128xf32, #tpu.memory_space<vmem>>, vector<1x128xf32>,
    return
  }
  func.func @transform_0(%arg0: i32) -> (i32, i32) {
    %c0_i32 = arith.constant 0 : i32
    %c0_i32_0 = arith.constant 0 : i32
    return %c0_i32, %arg0 : i32, i32
  }
  func.func @transform_1(%arg0: i32) -> (i32, i32) {
    %c0_i32 = arith.constant 0 : i32
    %c0_i32_0 = arith.constant 0 : i32
    %c0_i32_1 = arith.constant 0 : i32
    return %c0_i32, %c0_i32_0 : i32, i32
  }
  func.func @transform_2(%arg0: i32) -> i32 {
    %c0_i32 = arith.constant 0 : i32
    %c0_i32_0 = arith.constant 0 : i32
    return %c0_i32 : i32
  }
  func.func @transform_3(%arg0: i32) -> (i32, i32) {
    %c0_i32 = arith.constant 0 : i32
    %c0_i32_0 = arith.constant 0 : i32
    return %c0_i32, %arg0 : i32, i32
  }
}

module attributes {stable_mosaic.version = 11 : i64} {
  func.func @_fm_kernel(%arg0: i32, %arg1: memref<4x128xi32, #tpu.memory_space<vmem>>, %arg2: memref<40x32xf32, #tpu.memory_space<vmem>>, %arg3: memref<1xf32, #tpu.memory_space<smem>>, %arg4: memref<1x128xf32, #tpu.memory_space<vmem>>) attributes {dimension_semantics = [#tpu.dimension_semantics<parallel>], iteration_bounds = array<i64: 1>, scalar_prefetch = 0 : i64, scratch_operands = 0 : i64, tpu.core_type = #tpu.core_type<tc>, window_params = [{transform_indices = @transform_0, window_bounds = array<i64: 4, 128>}, {pipeline_mode = #tpu.pipeline_mode<synchronous>, transform_indices = @transform_1, window_bounds = array<i64: 40, 32>}, {transform_indices = @transform_2, window_bounds = array<i64: 1>}, {transform_indices = @transform_3, window_bounds = array<i64: 1, 128>}]} {
    %c0 = arith.constant 0 : index
    %c0_0 = arith.constant 0 : index
    %0 = vector.load %arg2[%c0, %c0_0] : memref<40x32xf32, #tpu.memory_space<vmem>>, vector<40x32xf32>
    %1 = tpu.iota {dimensions = array<i32: 0>} : vector<32x128xi32>
    %cst = arith.constant 0.000000e+00 : f32
    %2 = vector.broadcast %cst : f32 to vector<32x128xf32>
    %c0_1 = arith.constant 0 : index
    %c0_2 = arith.constant 0 : index
    %3 = vector.load %arg1[%c0_1, %c0_2] : memref<4x128xi32, #tpu.memory_space<vmem>>, vector<1x128xi32>
    %4 = vector.broadcast %3 : vector<1x128xi32> to vector<32x128xi32>
    %5 = arith.cmpi eq, %4, %1 : vector<32x128xi32>
    %6 = arith.extui %5 : vector<32x128xi1> to vector<32x128xi32>
    %7 = arith.sitofp %6 : vector<32x128xi32> to vector<32x128xf32>
    %8 = arith.addf %2, %7 : vector<32x128xf32>
    %c1 = arith.constant 1 : index
    %c0_3 = arith.constant 0 : index
    %9 = vector.load %arg1[%c1, %c0_3] : memref<4x128xi32, #tpu.memory_space<vmem>>, vector<1x128xi32>
    %10 = vector.broadcast %9 : vector<1x128xi32> to vector<32x128xi32>
    %11 = arith.cmpi eq, %10, %1 : vector<32x128xi32>
    %12 = arith.extui %11 : vector<32x128xi1> to vector<32x128xi32>
    %13 = arith.sitofp %12 : vector<32x128xi32> to vector<32x128xf32>
    %14 = arith.addf %8, %13 : vector<32x128xf32>
    %c2 = arith.constant 2 : index
    %c0_4 = arith.constant 0 : index
    %15 = vector.load %arg1[%c2, %c0_4] : memref<4x128xi32, #tpu.memory_space<vmem>>, vector<1x128xi32>
    %16 = vector.broadcast %15 : vector<1x128xi32> to vector<32x128xi32>
    %17 = arith.cmpi eq, %16, %1 : vector<32x128xi32>
    %18 = arith.extui %17 : vector<32x128xi1> to vector<32x128xi32>
    %19 = arith.sitofp %18 : vector<32x128xi32> to vector<32x128xf32>
    %20 = arith.addf %14, %19 : vector<32x128xf32>
    %c3 = arith.constant 3 : index
    %c0_5 = arith.constant 0 : index
    %21 = vector.load %arg1[%c3, %c0_5] : memref<4x128xi32, #tpu.memory_space<vmem>>, vector<1x128xi32>
    %22 = vector.broadcast %21 : vector<1x128xi32> to vector<32x128xi32>
    %23 = arith.cmpi eq, %22, %1 : vector<32x128xi32>
    %24 = arith.extui %23 : vector<32x128xi1> to vector<32x128xi32>
    %25 = arith.sitofp %24 : vector<32x128xi32> to vector<32x128xf32>
    %26 = arith.addf %20, %25 : vector<32x128xf32>
    %cst_6 = arith.constant dense<0.000000e+00> : vector<40x128xf32>
    %27 = tpu.matmul %0, %26, %cst_6 {dimension_numbers = #tpu.dot_dimension_numbers<[1], [0], [0], [1], [0, 0, 1, 1], [], []>} : vector<40x32xf32>, vector<32x128xf32>, vector<40x128xf32> -> vector<40x128xf32>
    %28 = vector.extract_strided_slice %27 {offsets = [0, 0], sizes = [32, 128], strides = [1, 1]} : vector<40x128xf32> to vector<32x128xf32>
    %29 = arith.mulf %28, %28 : vector<32x128xf32>
    %cst_7 = arith.constant dense<0.000000e+00> : vector<128xf32>
    %30 = vector.multi_reduction <add>, %29, %cst_7 [0] : vector<32x128xf32> to vector<128xf32>
    %31 = vector.shape_cast %30 : vector<128xf32> to vector<1x128xf32>
    %32 = vector.extract_strided_slice %27 {offsets = [32, 0], sizes = [1, 128], strides = [1, 1]} : vector<40x128xf32> to vector<1x128xf32>
    %33 = vector.extract_strided_slice %27 {offsets = [33, 0], sizes = [1, 128], strides = [1, 1]} : vector<40x128xf32> to vector<1x128xf32>
    %34 = arith.subf %31, %32 : vector<1x128xf32>
    %cst_8 = arith.constant 5.000000e-01 : f32
    %35 = vector.broadcast %cst_8 : f32 to vector<1x128xf32>
    %36 = arith.mulf %35, %34 : vector<1x128xf32>
    %c0_9 = arith.constant 0 : index
    %37 = memref.load %arg3[%c0_9] : memref<1xf32, #tpu.memory_space<smem>>
    %38 = vector.broadcast %37 : f32 to vector<1x128xf32>
    %39 = arith.addf %33, %38 : vector<1x128xf32>
    %40 = arith.addf %39, %36 : vector<1x128xf32>
    %41 = arith.negf %40 : vector<1x128xf32>
    %42 = math.exp %41 : vector<1x128xf32>
    %cst_10 = arith.constant 1.000000e+00 : f32
    %43 = vector.broadcast %cst_10 : f32 to vector<1x128xf32>
    %44 = arith.addf %43, %42 : vector<1x128xf32>
    %45 = arith.divf %43, %44 : vector<1x128xf32>
    %c0_11 = arith.constant 0 : index
    %c0_12 = arith.constant 0 : index
    %46 = vector.load %arg4[%c0_11, %c0_12] : memref<1x128xf32, #tpu.memory_space<vmem>>, vector<1x128xf32>
    tpu.vector_store %arg4[%c0_11, %c0_12], %45 {strides = array<i32>} : memref<1x128xf32, #tpu.memory_space<vmem>>, vector<1x128xf32>,
    return
  }
  func.func @transform_0(%arg0: i32) -> (i32, i32) {
    %c0_i32 = arith.constant 0 : i32
    %c0_i32_0 = arith.constant 0 : i32
    return %c0_i32, %arg0 : i32, i32
  }
  func.func @transform_1(%arg0: i32) -> (i32, i32) {
    %c0_i32 = arith.constant 0 : i32
    %c0_i32_0 = arith.constant 0 : i32
    %c0_i32_1 = arith.constant 0 : i32
    return %c0_i32, %c0_i32_0 : i32, i32
  }
  func.func @transform_2(%arg0: i32) -> i32 {
    %c0_i32 = arith.constant 0 : i32
    %c0_i32_0 = arith.constant 0 : i32
    return %c0_i32 : i32
  }
  func.func @transform_3(%arg0: i32) -> (i32, i32) {
    %c0_i32 = arith.constant 0 : i32
    %c0_i32_0 = arith.constant 0 : i32
    return %c0_i32, %arg0 : i32, i32
  }
}

</mosaic_0001>

<bundles_post_ra>
// kernel: tpu_custom_call.1
= control target key start
LH: loop header
LB: loop body
LE: loop exit
PB: predicated region body
PF: predicated region fallthrough
CT: control target
= control target key end

     0   :  { %v21_v0 = vlaneseq  ;;  %s324_s0 = inlined_call_operand.vmem [shape: s32[4,128], index: 0, kind: input, shape index: {}]   ;;  %s325_s1 = inlined_call_operand.vmem [shape: f32[40,32], index: 1, kind: input, shape index: {}]   ;;  %s326_s2 = inlined_call_operand.<no memory space> [shape: f32[1], index: 2, kind: input, shape index: {}]   ;;  %s327_s3 = inlined_call_operand.hbm [shape: f32[1,128], index: 3, kind: output, shape index: {}]  }
   0x1   :  { %v26_v2 = vld [vmem:[%s324_s0] ss:$0 sm:$0xff]  ;;  %v43_v3 = vld [vmem:[%s324_s0 + $0x1] ss:$0 sm:$0xff]  ;;  %v60_v4 = vld [vmem:[%s324_s0 + $0x2] ss:$0 sm:$0xff] }
   0x2   :  { %v22_v1 = vshrl.u32 %v21_v0, 7  ;;  %v77_v5 = vld [vmem:[%s324_s0 + $0x3] ss:$0 sm:$0xff] }
   0x3   :  { %9 = vsyncpa [#allocation4], 0  ;;  %v266_v9 = vmov 0.0   ;;  %v18_v38 = vld [vmem:[%s325_s1 + $0x10] sm:$0xff]  ;;  %v19_v39 = vld [vmem:[%s325_s1 + $0x18] sm:$0xff]  ;;  %v158_v62 = vstv %s326_s2  ;;  %s267_s30 = smov [#allocation3]  }
   0x4   :  { %v25_v6 = vadd.s32 24, %v22_v1  ;;  %v24_v7 = vadd.s32 16, %v22_v1  ;;  %v23_v8 = vadd.s32 8, %v22_v1  ;;  %vm27_vm0 = vcmp.eq.s32.totalorder %v26_v2, %v22_v1  ;;  %v16_v40 = vld [vmem:[%s325_s1] sm:$0xff]  ;;  %v17_v41 = vld [vmem:[%s325_s1 + $0x8] sm:$0xff]  ;;  %s189_s4 = sshll.u32 %s267_s30, 4  ;;  %s190_s4 = int_to_ptr.vmem [resolvable:$true] %s189_s4 }
   0x5   :  { %v200_v10 = vsel %vm27_vm0, 1.0, %v266_v9  ;;  %vm44_vm1 = vcmp.eq.s32.totalorder %v43_v3, %v22_v1  ;;  %vm61_vm2 = vcmp.eq.s32.totalorder %v60_v4, %v22_v1  ;;  %vm78_vm3 = vcmp.eq.s32.totalorder %v77_v5, %v22_v1  ;;  %v20_v42 = vld [vmem:[%s325_s1 + $0x20] sm:$0xff]  ;;  %s191_s6 = sshll.u32 %s327_s3, 4  ;;  %s192_s6 = int_to_ptr.hbm [resolvable:$true] %s191_s6 }
   0x6   :  { %vm30_vm4 = vcmp.eq.s32.totalorder %v26_v2, %v25_v6  ;;  %vm47_vm5 = vcmp.eq.s32.totalorder %v43_v3, %v25_v6  ;;  %vm64_vm6 = vcmp.eq.s32.totalorder %v60_v4, %v25_v6  ;;  %vm81_vm7 = vcmp.eq.s32.totalorder %v77_v5, %v25_v6 }
   0x7   :  { %v203_v11 = vsel %vm30_vm4, 1.0, %v266_v9  ;;  %v207_v12 = vsel %vm47_vm5, 1.0, %v266_v9  ;;  %v211_v13 = vsel %vm64_vm6, 1.0, %v266_v9  ;;  %v215_v14 = vsel %vm81_vm7, 1.0, %v266_v9 }
   0x8   :  { %v59_v15 = vadd.f32 %v207_v12, %v203_v11  ;;  %vm29_vm8 = vcmp.eq.s32.totalorder %v26_v2, %v24_v7  ;;  %vm46_vm9 = vcmp.eq.s32.totalorder %v43_v3, %v24_v7  ;;  %vm63_vm10 = vcmp.eq.s32.totalorder %v60_v4, %v24_v7 }
   0x9   :  { %v202_v16 = vsel %vm29_vm8, 1.0, %v266_v9  ;;  %v206_v17 = vsel %vm46_vm9, 1.0, %v266_v9  ;;  %v210_v18 = vsel %vm63_vm10, 1.0, %v266_v9  ;;  %vm80_vm11 = vcmp.eq.s32.totalorder %v77_v5, %v24_v7 }
   0xa   :  { %v76_v19 = vadd.f32 %v211_v13, %v59_v15  ;;  %v58_v20 = vadd.f32 %v206_v17, %v202_v16  ;;  %v214_v21 = vsel %vm80_vm11, 1.0, %v266_v9  ;;  %vm28_vm12 = vcmp.eq.s32.totalorder %v26_v2, %v23_v8 }
   0xb   :  { %v201_v22 = vsel %vm28_vm12, 1.0, %v266_v9  ;;  %vm45_vm13 = vcmp.eq.s32.totalorder %v43_v3, %v23_v8  ;;  %vm62_vm14 = vcmp.eq.s32.totalorder %v60_v4, %v23_v8  ;;  %vm79_vm15 = vcmp.eq.s32.totalorder %v77_v5, %v23_v8 }
   0xc   :  { %v93_v23 = vadd.f32 %v215_v14, %v76_v19  ;;  %v75_v24 = vadd.f32 %v210_v18, %v58_v20  ;;  %v205_v25 = vsel %vm45_vm13, 1.0, %v266_v9  ;;  %v209_v26 = vsel %vm62_vm14, 1.0, %v266_v9 }
   0xd   :  { %v57_v27 = vadd.f32 %v205_v25, %v201_v22  ;;  %v204_v28 = vsel %vm44_vm1, 1.0, %v266_v9  ;;  %v208_v29 = vsel %vm61_vm2, 1.0, %v266_v9  ;;  %v213_v31 = vsel %vm79_vm15, 1.0, %v266_v9 }
   0xe   :  { %223 = vmatpush.msra.mxu2 %v93_v23  ;;  %224 = vmatpush.msra.mxu3 %v93_v23  ;;  %v92_v30 = vadd.f32 %v214_v21, %v75_v24  ;;  %v56_v32 = vadd.f32 %v204_v28, %v200_v10  ;;  %v212_v34 = vsel %vm78_vm3, 1.0, %v266_v9  ;;  %vm94_vm0 = vcmask 261120  }
   0xf   :  { %122 = vmatpush.msra.mxu0 %v93_v23  ;;  %222 = vmatpush.msra.mxu1 %v93_v23  ;;  %v74_v33 = vadd.f32 %v209_v26, %v57_v27 }
  0x10   :  { %226 = vmatpush.msra.mxu2 %v92_v30  ;;  %227 = vmatpush.msra.mxu3 %v92_v30  ;;  %v73_v35 = vadd.f32 %v208_v29, %v56_v32 }
  0x11   :  { %v91_v36 = vadd.f32 %v213_v31, %v74_v33  ;;  %123 = vmatpush.msra.mxu0 %v92_v30  ;;  %225 = vmatpush.msra.mxu1 %v92_v30 }
  0x12   :  { %v90_v37 = vadd.f32 %v212_v34, %v73_v35 }
  0x13   :  { %229 = vmatpush.msra.mxu2 %v91_v36  ;;  %230 = vmatpush.msra.mxu3 %v91_v36 }
  0x14   :  { %124 = vmatpush.msra.mxu0 %v91_v36  ;;  %228 = vmatpush.msra.mxu1 %v91_v36 }
  0x15   :  { %232 = vmatpush.msra.mxu2 %v90_v37  ;;  %233 = vmatpush.msra.mxu3 %v90_v37 }
  0x16   :  { %218 = vmatmul.msk.f32.vlgmr.msra.gmra.mxu2 %vm94_vm0, %v18_v38  ;;  %219 = vmatmul.msk.f32.vlgmr.msra.gmra.mxu3 %vm94_vm0, %v19_v39 }
  0x17   :  { %125 = vmatpush.msra.mxu0 %v90_v37  ;;  %231 = vmatpush.msra.mxu1 %v90_v37 }
  0x18   :  { %216 = vmatmul.msk.f32.vlgmr.msra.gmra.mxu0 %vm94_vm0, %v16_v40  ;;  %217 = vmatmul.msk.f32.vlgmr.msra.gmra.mxu1 %vm94_vm0, %v17_v41 }
  0x1e   :  { %220 = vmatmul.msk.f32.gmra.mxu3 %vm94_vm0, %v20_v42 }
  0x95   :  { %v127_v43 = vpop.f32.mrf.mxu0  ;;  %v130_v44 = vpop.f32.mrf.mxu1 }
  0x96   :  { %v142_v45 = vmul.f32 %v127_v43, %v127_v43  ;;  %v143_v46 = vmul.f32 %v130_v44, %v130_v44 }
  0x98   :  { %v146_v47 = vadd.f32 %v143_v46, %v142_v45 }
  0x99   :  { %v133_v48 = vpop.f32.mrf.mxu2  ;;  %v136_v49 = vpop.f32.mrf.mxu3 }
  0x9a   :  { %v144_v50 = vmul.f32 %v133_v48, %v133_v48  ;;  %v145_v51 = vmul.f32 %v136_v49, %v136_v49 }
  0x9c   :  { %v147_v52 = vadd.f32 %v146_v47, %v144_v50 }
  0x9e   :  { %v148_v53 = vadd.f32 %v147_v52, %v145_v51 }
  0xa0   :  { %v149_v54 = vrot.slane %v148_v53, 4 }
  0xa1   :  { %v139_v59 = vpop.f32.mrf.mxu3 }
  0xa2   :  { %v150_v55 = vadd.f32 %v149_v54, %v148_v53  ;;  %v159_v0 = vadd.f32 %v158_v62, %v139_v59 }
  0xa4   :  { %v151_v56 = vrot.slane %v150_v55, 2 }
  0xa6   :  { %v152_v57 = vadd.f32 %v151_v56, %v150_v55 }
  0xa8   :  { %v153_v58 = vrot.slane %v152_v57, 1 }
  0xaa   :  { %v154_v60 = vadd.f32 %v153_v58, %v152_v57 }
  0xac   :  { %v155_v61 = vsub.f32 %v154_v60, %v139_v59 }
  0xae   :  { %v156_v63 = vmul.f32 0.5, %v155_v61 }
  0xb0   :  { %v161_v1 = vrot.slane %v156_v63, 7 }
  0xb2   :  { %v163_v2 = vadd.f32 %v161_v1, %v159_v0 }
  0xb4   :  { %v221_v3 = vmul.f32 -1.442695, %v163_v2 }
  0xb6   :  { %236 = vpow2.f32 %v221_v3 }
  0xbc   :  { %v237_v4 = vpop.eup %236 }
  0xbd   :  { %v167_v5 = vadd.f32 1.0, %v237_v4 }
  0xbf   :  { %238 = vrcp.f32 %v167_v5  ;;  %v179_v9 = vand.u32 2147483648, %v167_v5  ;;  %v177_v11 = vand.u32 2147483647, %v167_v5  ;;  %vm173_vm2 = vweird.f32 %v167_v5 }
  0xc1   :  { %v180_v13 = vor.u32 1.1754944e-38, %v179_v9  ;;  %vm178_vm4 = vcmp.eq.f32.partialorder %v177_v11, 8.507059e+37 }
  0xc5   :  { %v239_v6 = vpop.eup %238 }
  0xc6   :  { %v169_v7 = vmul.f32 %v239_v6, %v167_v5  ;;  %vm174_vm1 = vweird.f32 %v239_v6 }
  0xc7   :  { %vm175_vm3 = vmor %vm173_vm2, %vm174_vm1 }
  0xc8   :  { %v170_v8 = vsub.f32 1.0, %v169_v7 }
  0xca   :  { %v171_v10 = vmul.f32 %v239_v6, %v170_v8 }
  0xcc   :  { %v172_v12 = vadd.f32 %v239_v6, %v171_v10 }
  0xce   :  { %v176_v14 = vsel %vm175_vm3, %v239_v6, %v172_v12 }
  0xcf   :  { %v181_v15 = vsel %vm178_vm4, %v180_v13, %v176_v14 }
  0xd0   :  { %183 = vst [vmem:[#allocation3 - $0x1] sm:$0x2] %v181_v15 }
  0xd1   :  { %194 = dma.vmem_to_hbm [thread:$0]  %s190_s4, 16, %s192_s6, [#allocation4]  }
  0xd2   :  { %264 = dma.done.wait [#allocation4], 16  }
  0xd3   :  { %265 = vsyncadd [#allocation4], 4294967280 }
  0xd4   :  { %199 = vsyncpa [#allocation4], 1 }

// kernel: tpu_custom_call.1
= control target key start
LH: loop header
LB: loop body
LE: loop exit
PB: predicated region body
PF: predicated region fallthrough
CT: control target
= control target key end

     0   :  { %v21_v0 = vlaneseq  ;;  %v274_v9 = vmov 0.0   ;;  %s332_s0 = inlined_call_operand.vmem [shape: s32[4,128], index: 0, kind: input, shape index: {}]   ;;  %s333_s1 = inlined_call_operand.vmem [shape: f32[40,32], index: 1, kind: input, shape index: {}]   ;;  %s334_s2 = inlined_call_operand.<no memory space> [shape: f32[1], index: 2, kind: input, shape index: {}]   ;;  %s335_s3 = inlined_call_operand.hbm [shape: f32[1,128], index: 3, kind: output, shape index: {}]  }
   0x1   :  { %v240_v1 = vld [vmem:[%s332_s0] ss:$0 sm:$0xff]  ;;  %v241_v2 = vld [vmem:[%s332_s0 + $0x1] ss:$0 sm:$0xff]  ;;  %v242_v4 = vld [vmem:[%s332_s0 + $0x2] ss:$0 sm:$0xff] }
   0x2   :  { %v22_v3 = vshrl.u32 %v21_v0, 7  ;;  %v243_v5 = vld [vmem:[%s332_s0 + $0x3] ss:$0 sm:$0xff] }
   0x4   :  { %v25_v6 = vadd.s32 24, %v22_v3  ;;  %v24_v7 = vadd.s32 16, %v22_v3  ;;  %v23_v8 = vadd.s32 8, %v22_v3  ;;  %vm28_vm0 = vcmp.eq.s32.totalorder %v240_v1, %v22_v3 }
   0x5   :  { %v204_v10 = vsel %vm28_vm0, 1.0, %v274_v9  ;;  %vm46_vm1 = vcmp.eq.s32.totalorder %v241_v2, %v22_v3  ;;  %vm64_vm2 = vcmp.eq.s32.totalorder %v242_v4, %v22_v3  ;;  %vm82_vm3 = vcmp.eq.s32.totalorder %v243_v5, %v22_v3 }
   0x6   :  { %9 = vsyncpa [#allocation4], 0  ;;  %vm31_vm4 = vcmp.eq.s32.totalorder %v240_v1, %v25_v6  ;;  %vm49_vm5 = vcmp.eq.s32.totalorder %v241_v2, %v25_v6  ;;  %vm67_vm6 = vcmp.eq.s32.totalorder %v242_v4, %v25_v6  ;;  %vm85_vm7 = vcmp.eq.s32.totalorder %v243_v5, %v25_v6  ;;  %v18_v38 = vld [vmem:[%s333_s1 + $0x10] sm:$0xff]  ;;  %v19_v39 = vld [vmem:[%s333_s1 + $0x18] sm:$0xff]  ;;  %s275_s30 = smov [#allocation3]   ;;  %s195_s6 = sshll.u32 %s335_s3, 4  ;;  %s196_s6 = int_to_ptr.hbm [resolvable:$true] %s195_s6 }
   0x7   :  { %v207_v11 = vsel %vm31_vm4, 1.0, %v274_v9  ;;  %v211_v12 = vsel %vm49_vm5, 1.0, %v274_v9  ;;  %v215_v13 = vsel %vm67_vm6, 1.0, %v274_v9  ;;  %v219_v14 = vsel %vm85_vm7, 1.0, %v274_v9  ;;  %v16_v40 = vld [vmem:[%s333_s1] sm:$0xff]  ;;  %v17_v41 = vld [vmem:[%s333_s1 + $0x8] sm:$0xff] }
   0x8   :  { %v61_v15 = vadd.f32 %v211_v12, %v207_v11  ;;  %vm30_vm8 = vcmp.eq.s32.totalorder %v240_v1, %v24_v7  ;;  %vm48_vm9 = vcmp.eq.s32.totalorder %v241_v2, %v24_v7  ;;  %vm66_vm10 = vcmp.eq.s32.totalorder %v242_v4, %v24_v7  ;;  %v20_v42 = vld [vmem:[%s333_s1 + $0x20] sm:$0xff]  ;;  %s193_s4 = sshll.u32 %s275_s30, 4  ;;  %s194_s4 = int_to_ptr.vmem [resolvable:$true] %s193_s4 }
   0x9   :  { %v206_v16 = vsel %vm30_vm8, 1.0, %v274_v9  ;;  %v210_v17 = vsel %vm48_vm9, 1.0, %v274_v9  ;;  %v214_v18 = vsel %vm66_vm10, 1.0, %v274_v9  ;;  %vm84_vm11 = vcmp.eq.s32.totalorder %v243_v5, %v24_v7 }
   0xa   :  { %v79_v19 = vadd.f32 %v215_v13, %v61_v15  ;;  %v60_v20 = vadd.f32 %v210_v17, %v206_v16  ;;  %v218_v21 = vsel %vm84_vm11, 1.0, %v274_v9  ;;  %vm29_vm12 = vcmp.eq.s32.totalorder %v240_v1, %v23_v8 }
   0xb   :  { %v205_v22 = vsel %vm29_vm12, 1.0, %v274_v9  ;;  %vm47_vm13 = vcmp.eq.s32.totalorder %v241_v2, %v23_v8  ;;  %vm65_vm14 = vcmp.eq.s32.totalorder %v242_v4, %v23_v8  ;;  %vm83_vm15 = vcmp.eq.s32.totalorder %v243_v5, %v23_v8 }
   0xc   :  { %v97_v23 = vadd.f32 %v219_v14, %v79_v19  ;;  %v78_v24 = vadd.f32 %v214_v18, %v60_v20  ;;  %v209_v25 = vsel %vm47_vm13, 1.0, %v274_v9  ;;  %v213_v26 = vsel %vm65_vm14, 1.0, %v274_v9 }
   0xd   :  { %v59_v27 = vadd.f32 %v209_v25, %v205_v22  ;;  %v208_v28 = vsel %vm46_vm1, 1.0, %v274_v9  ;;  %v212_v29 = vsel %vm64_vm2, 1.0, %v274_v9  ;;  %v217_v31 = vsel %vm83_vm15, 1.0, %v274_v9 }
   0xe   :  { %227 = vmatpush.msra.mxu2 %v97_v23  ;;  %228 = vmatpush.msra.mxu3 %v97_v23  ;;  %v96_v30 = vadd.f32 %v218_v21, %v78_v24  ;;  %v58_v32 = vadd.f32 %v208_v28, %v204_v10  ;;  %v216_v34 = vsel %vm82_vm3, 1.0, %v274_v9  ;;  %vm98_vm0 = vcmask 261120  }
   0xf   :  { %126 = vmatpush.msra.mxu0 %v97_v23  ;;  %226 = vmatpush.msra.mxu1 %v97_v23  ;;  %v77_v33 = vadd.f32 %v213_v26, %v59_v27  ;;  %v162_v62 = vstv %s334_s2 }
  0x10   :  { %230 = vmatpush.msra.mxu2 %v96_v30  ;;  %231 = vmatpush.msra.mxu3 %v96_v30  ;;  %v76_v35 = vadd.f32 %v212_v29, %v58_v32 }
  0x11   :  { %v95_v36 = vadd.f32 %v217_v31, %v77_v33  ;;  %127 = vmatpush.msra.mxu0 %v96_v30  ;;  %229 = vmatpush.msra.mxu1 %v96_v30 }
  0x12   :  { %v94_v37 = vadd.f32 %v216_v34, %v76_v35 }
  0x13   :  { %233 = vmatpush.msra.mxu2 %v95_v36  ;;  %234 = vmatpush.msra.mxu3 %v95_v36 }
  0x14   :  { %128 = vmatpush.msra.mxu0 %v95_v36  ;;  %232 = vmatpush.msra.mxu1 %v95_v36 }
  0x15   :  { %236 = vmatpush.msra.mxu2 %v94_v37  ;;  %237 = vmatpush.msra.mxu3 %v94_v37 }
  0x16   :  { %222 = vmatmul.msk.f32.vlgmr.msra.gmra.mxu2 %vm98_vm0, %v18_v38  ;;  %223 = vmatmul.msk.f32.vlgmr.msra.gmra.mxu3 %vm98_vm0, %v19_v39 }
  0x17   :  { %129 = vmatpush.msra.mxu0 %v94_v37  ;;  %235 = vmatpush.msra.mxu1 %v94_v37 }
  0x18   :  { %220 = vmatmul.msk.f32.vlgmr.msra.gmra.mxu0 %vm98_vm0, %v16_v40  ;;  %221 = vmatmul.msk.f32.vlgmr.msra.gmra.mxu1 %vm98_vm0, %v17_v41 }
  0x1e   :  { %224 = vmatmul.msk.f32.gmra.mxu3 %vm98_vm0, %v20_v42 }
  0x95   :  { %v131_v43 = vpop.f32.mrf.mxu0  ;;  %v134_v44 = vpop.f32.mrf.mxu1 }
  0x96   :  { %v146_v45 = vmul.f32 %v131_v43, %v131_v43  ;;  %v147_v46 = vmul.f32 %v134_v44, %v134_v44 }
  0x98   :  { %v150_v47 = vadd.f32 %v147_v46, %v146_v45 }
  0x99   :  { %v137_v48 = vpop.f32.mrf.mxu2  ;;  %v140_v49 = vpop.f32.mrf.mxu3 }
  0x9a   :  { %v148_v50 = vmul.f32 %v137_v48, %v137_v48  ;;  %v149_v51 = vmul.f32 %v140_v49, %v140_v49 }
  0x9c   :  { %v151_v52 = vadd.f32 %v150_v47, %v148_v50 }
  0x9e   :  { %v152_v53 = vadd.f32 %v151_v52, %v149_v51 }
  0xa0   :  { %v153_v54 = vrot.slane %v152_v53, 4 }
  0xa1   :  { %v143_v59 = vpop.f32.mrf.mxu3 }
  0xa2   :  { %v154_v55 = vadd.f32 %v153_v54, %v152_v53  ;;  %v163_v0 = vadd.f32 %v162_v62, %v143_v59 }
  0xa4   :  { %v155_v56 = vrot.slane %v154_v55, 2 }
  0xa6   :  { %v156_v57 = vadd.f32 %v155_v56, %v154_v55 }
  0xa8   :  { %v157_v58 = vrot.slane %v156_v57, 1 }
  0xaa   :  { %v158_v60 = vadd.f32 %v157_v58, %v156_v57 }
  0xac   :  { %v159_v61 = vsub.f32 %v158_v60, %v143_v59 }
  0xae   :  { %v160_v63 = vmul.f32 0.5, %v159_v61 }
  0xb0   :  { %v165_v1 = vrot.slane %v160_v63, 7 }
  0xb2   :  { %v167_v2 = vadd.f32 %v165_v1, %v163_v0 }
  0xb4   :  { %v225_v3 = vmul.f32 -1.442695, %v167_v2 }
  0xb6   :  { %244 = vpow2.f32 %v225_v3 }
  0xbc   :  { %v245_v4 = vpop.eup %244 }
  0xbd   :  { %v171_v5 = vadd.f32 1.0, %v245_v4 }
  0xbf   :  { %246 = vrcp.f32 %v171_v5  ;;  %v183_v9 = vand.u32 2147483648, %v171_v5  ;;  %v181_v11 = vand.u32 2147483647, %v171_v5  ;;  %vm177_vm2 = vweird.f32 %v171_v5 }
  0xc1   :  { %v184_v13 = vor.u32 1.1754944e-38, %v183_v9  ;;  %vm182_vm4 = vcmp.eq.f32.partialorder %v181_v11, 8.507059e+37 }
  0xc5   :  { %v247_v6 = vpop.eup %246 }
  0xc6   :  { %v173_v7 = vmul.f32 %v247_v6, %v171_v5  ;;  %vm178_vm1 = vweird.f32 %v247_v6 }
  0xc7   :  { %vm179_vm3 = vmor %vm177_vm2, %vm178_vm1 }
  0xc8   :  { %v174_v8 = vsub.f32 1.0, %v173_v7 }
  0xca   :  { %v175_v10 = vmul.f32 %v247_v6, %v174_v8 }
  0xcc   :  { %v176_v12 = vadd.f32 %v247_v6, %v175_v10 }
  0xce   :  { %v180_v14 = vsel %vm179_vm3, %v247_v6, %v176_v12 }
  0xcf   :  { %v185_v15 = vsel %vm182_vm4, %v184_v13, %v180_v14 }
  0xd0   :  { %187 = vst [vmem:[#allocation3 - $0x1] sm:$0x2] %v185_v15 }
  0xd1   :  { %198 = dma.vmem_to_hbm [thread:$0]  %s194_s4, 16, %s196_s6, [#allocation4]  }
  0xd2   :  { %272 = dma.done.wait [#allocation4], 16  }
  0xd3   :  { %273 = vsyncadd [#allocation4], 4294967280 }
  0xd4   :  { %203 = vsyncpa [#allocation4], 1 }

</bundles_post_ra>
